<compile_context>
chip_gen: v7x
topology: tpu7x:2x2x1
jax: 0.10.0
libtpu: 0.0.40
codegen_flags: <defaults>
</compile_context>

<pallas_src>
import jax
import jax.numpy as jnp
from jax.experimental import pallas as pl
from jax.experimental.pallas import tpu as pltpu


def _round_up(a: int, b: int) -> int:
    return (a + b - 1) // b * b


def mlp_softmax_kernel(x_ref, w1_ref, b1_ref, w2_ref, b2_ref, o_ref):
    # x_ref: (BM, Kpad)  w1_ref: (Kpad, 256)  b1_ref: (1, 256)
    # w2_ref: (256, 10)  b2_ref: (1, 10)      o_ref: (BM, 10)

    # hidden = relu(x @ W1 + b1)  -- MXU matmul, f32 accumulation
    h = jnp.dot(x_ref[...], w1_ref[...], preferred_element_type=jnp.float32)
    h = jnp.maximum(h + b1_ref[...], 0.0)

    # logits = h @ W2 + b2   (cast h to the weight compute dtype so the second
    # matmul also runs on the bf16 MXU path when compute_dtype=bf16)
    h = h.astype(w2_ref.dtype)
    logits = jnp.dot(h, w2_ref[...], preferred_element_type=jnp.float32) + b2_ref[...]

    # numerically-stable softmax over the class axis; reciprocal on the EUP
    m = jnp.max(logits, axis=-1, keepdims=True)
    e = jnp.exp(logits - m)
    s = jnp.sum(e, axis=-1, keepdims=True)
    o_ref[...] = (e * pl.reciprocal(s, approx=True)).astype(o_ref.dtype)


def network_forward(x, w1, b1, w2, b2, *, block_batch=512,
                    compute_dtype=jnp.bfloat16):
    """x: (B, 784) f32 -> (B, 10) f32 softmax probabilities."""
    B, D_in = x.shape
    D_hid = w1.shape[1]
    D_out = w2.shape[1]

    # --- pad K (784 -> 896 = 7*128) so the x lane dimension is fully dense.
    D_in_pad = _round_up(D_in, 128)
    if D_in_pad != D_in:
        x = jnp.pad(x, ((0, 0), (0, D_in_pad - D_in)))
        w1 = jnp.pad(w1, ((0, D_in_pad - D_in), (0, 0)))

    # --- pick the batch tile: big, multiple of 8, but keep >= 2 grid steps
    #     when the batch allows it so v7x can shard the parallel axis over 2 TCs.
    bm = max(8, min(block_batch, _round_up(B, 8)))
    bm = (bm // 8) * 8
    if _round_up(B, bm) // bm < 2 and B > 8:
        bm = max(8, _round_up((B + 1) // 2, 8))
    B_pad = _round_up(B, bm)
    if B_pad != B:
        x = jnp.pad(x, ((0, B_pad - B), (0, 0)))

    # --- compute-dtype cast (HBM traffic halved; accumulation stays f32).
    x_c = x.astype(compute_dtype)
    w1_c = w1.astype(compute_dtype)
    w2_c = w2.astype(compute_dtype)
    b1_2d = b1.reshape(1, D_hid).astype(jnp.float32)
    b2_2d = b2.reshape(1, D_out).astype(jnp.float32)

    out = pl.pallas_call(
        mlp_softmax_kernel,
        out_shape=jax.ShapeDtypeStruct((B_pad, D_out), jnp.float32),
        grid_spec=pltpu.PrefetchScalarGridSpec(
            num_scalar_prefetch=0,
            grid=(B_pad // bm,),
            in_specs=[
                pl.BlockSpec((bm, D_in_pad), lambda i: (i, 0)),   # x tile
                pl.BlockSpec((D_in_pad, D_hid), lambda i: (0, 0)),  # W1 (resident)
                pl.BlockSpec((1, D_hid), lambda i: (0, 0)),         # b1
                pl.BlockSpec((D_hid, D_out), lambda i: (0, 0)),     # W2 (resident)
                pl.BlockSpec((1, D_out), lambda i: (0, 0)),         # b2
            ],
            out_specs=pl.BlockSpec((bm, D_out), lambda i: (i, 0)),
        ),
        compiler_params=pltpu.CompilerParams(
            dimension_semantics=("parallel",),
            vmem_limit_bytes=32 * 1024 * 1024,
        ),
    )(x_c, w1_c, b1_2d, w2_c, b2_2d)

    return out[:B]


def network_forward_ref(x, w1, b1, w2, b2):
    h = jnp.maximum(x @ w1 + b1, 0.0)
    logits = h @ w2 + b2
    return jax.nn.softmax(logits, axis=-1)


if __name__ == "__main__":
    key = jax.random.PRNGKey(0)
    k_x, k_w1, k_b1, k_w2, k_b2 = jax.random.split(key, 5)

    B, D_in, D_hid, D_out = 16, 784, 256, 10
    n_classes = D_out  # the forward's `n_classes` arg: class count, no math effect

    x = jax.random.normal(k_x, (B, D_in), dtype=jnp.float32)
    w1 = jax.random.normal(k_w1, (D_in, D_hid), dtype=jnp.float32) * (1.0 / jnp.sqrt(D_in))
    b1 = jax.random.normal(k_b1, (D_hid,), dtype=jnp.float32) * 0.01
    w2 = jax.random.normal(k_w2, (D_hid, D_out), dtype=jnp.float32) * (1.0 / jnp.sqrt(D_hid))
    b2 = jax.random.normal(k_b2, (D_out,), dtype=jnp.float32) * 0.01

    ref = network_forward_ref(x, w1, b1, w2, b2)

    # f32 compute path (tight-ish tolerance; approx reciprocal ~1e-4 rel error)
    out_f32 = jax.block_until_ready(
        network_forward(x, w1, b1, w2, b2, compute_dtype=jnp.float32))
    assert out_f32.shape == (B, D_out)
    assert jnp.allclose(out_f32, ref, atol=2e-3, rtol=2e-3), "f32 path mismatch"
    assert jnp.allclose(jnp.sum(out_f32, axis=-1), 1.0, atol=5e-3), "rows must sum to ~1"

    # bf16 compute path (default / fast path; inputs rounded so looser tolerance)
    out_bf16 = jax.block_until_ready(
        network_forward(x, w1, b1, w2, b2, compute_dtype=jnp.bfloat16))
    assert out_bf16.shape == (B, D_out)
    assert jnp.allclose(out_bf16, ref, atol=2e-2, rtol=2e-2), "bf16 path mismatch"
    assert jnp.allclose(jnp.sum(out_bf16, axis=-1), 1.0, atol=1e-2), "rows must sum to ~1"

    print("KERNEL_OK")
</pallas_src>

<mosaic_0001>
module attributes {stable_mosaic.version = 11 : i64} {
  func.func @mlp_softmax_kernel(%arg0: i32, %arg1: memref<8x896xf32, #tpu.memory_space<vmem>>, %arg2: memref<896x256xf32, #tpu.memory_space<vmem>>, %arg3: memref<1x256xf32, #tpu.memory_space<vmem>>, %arg4: memref<256x10xf32, #tpu.memory_space<vmem>>, %arg5: memref<1x10xf32, #tpu.memory_space<vmem>>, %arg6: memref<8x10xf32, #tpu.memory_space<vmem>>) attributes {dimension_semantics = [#tpu.dimension_semantics<parallel>], iteration_bounds = array<i64: 2>, scalar_prefetch = 0 : i64, scratch_operands = 0 : i64, tpu.core_type = #tpu.core_type<tc>, window_params = [{transform_indices = @transform_0, window_bounds = array<i64: 8, 896>}, {pipeline_mode = #tpu.pipeline_mode<synchronous>, transform_indices = @transform_1, window_bounds = array<i64: 896, 256>}, {pipeline_mode = #tpu.pipeline_mode<synchronous>, transform_indices = @transform_2, window_bounds = array<i64: 1, 256>}, {pipeline_mode = #tpu.pipeline_mode<synchronous>, transform_indices = @transform_3, window_bounds = array<i64: 256, 10>}, {pipeline_mode = #tpu.pipeline_mode<synchronous>, transform_indices = @transform_4, window_bounds = array<i64: 1, 10>}, {transform_indices = @transform_5, window_bounds = array<i64: 8, 10>}]} {
    %c0 = arith.constant 0 : index
    %c0_0 = arith.constant 0 : index
    %0 = vector.load %arg1[%c0, %c0_0] : memref<8x896xf32, #tpu.memory_space<vmem>>, vector<8x896xf32>
    %c0_1 = arith.constant 0 : index
    %c0_2 = arith.constant 0 : index
    %1 = vector.load %arg2[%c0_1, %c0_2] : memref<896x256xf32, #tpu.memory_space<vmem>>, vector<896x256xf32>
    %cst = arith.constant dense<0.000000e+00> : vector<8x256xf32>
    %2 = tpu.matmul %0, %1, %cst {dimension_numbers = #tpu.dot_dimension_numbers<[1], [0], [0], [1], [0, 0, 1, 1], [], []>} : vector<8x896xf32>, vector<896x256xf32>, vector<8x256xf32> -> vector<8x256xf32>
    %c0_3 = arith.constant 0 : index
    %c0_4 = arith.constant 0 : index
    %3 = vector.load %arg3[%c0_3, %c0_4] : memref<1x256xf32, #tpu.memory_space<vmem>>, vector<1x256xf32>
    %4 = vector.broadcast %3 : vector<1x256xf32> to vector<8x256xf32>
    %5 = arith.addf %2, %4 : vector<8x256xf32>
    %cst_5 = arith.constant 0.000000e+00 : f32
    %6 = vector.broadcast %cst_5 : f32 to vector<8x256xf32>
    %7 = arith.maximumf %5, %6 : vector<8x256xf32>
    %c0_6 = arith.constant 0 : index
    %c0_7 = arith.constant 0 : index
    %8 = vector.load %arg4[%c0_6, %c0_7] : memref<256x10xf32, #tpu.memory_space<vmem>>, vector<256x10xf32>
    %cst_8 = arith.constant dense<0.000000e+00> : vector<8x10xf32>
    %9 = tpu.matmul %7, %8, %cst_8 {dimension_numbers = #tpu.dot_dimension_numbers<[1], [0], [0], [1], [0, 0, 1, 1], [], []>} : vector<8x256xf32>, vector<256x10xf32>, vector<8x10xf32> -> vector<8x10xf32>
    %c0_9 = arith.constant 0 : index
    %c0_10 = arith.constant 0 : index
    %10 = vector.load %arg5[%c0_9, %c0_10] : memref<1x10xf32, #tpu.memory_space<vmem>>, vector<1x10xf32>
    %11 = vector.broadcast %10 : vector<1x10xf32> to vector<8x10xf32>
    %12 = arith.addf %9, %11 : vector<8x10xf32>
    %cst_11 = arith.constant dense<0xFF800000> : vector<8xf32>
    %13 = vector.multi_reduction <maximumf>, %12, %cst_11 [1] : vector<8x10xf32> to vector<8xf32>
    %14 = vector.shape_cast %13 : vector<8xf32> to vector<8x1xf32>
    %15 = vector.broadcast %14 : vector<8x1xf32> to vector<8x10xf32>
    %16 = arith.subf %12, %15 : vector<8x10xf32>
    %17 = math.exp %16 : vector<8x10xf32>
    %cst_12 = arith.constant dense<0.000000e+00> : vector<8xf32>
    %18 = vector.multi_reduction <add>, %17, %cst_12 [1] : vector<8x10xf32> to vector<8xf32>
    %19 = vector.shape_cast %18 : vector<8xf32> to vector<8x1xf32>
    %20 = tpu.reciprocal %19 {approx = true} : vector<8x1xf32> -> vector<8x1xf32>
    %21 = vector.broadcast %20 : vector<8x1xf32> to vector<8x10xf32>
    %22 = arith.mulf %17, %21 : vector<8x10xf32>
    %c0_13 = arith.constant 0 : index
    %c0_14 = arith.constant 0 : index
    %23 = vector.load %arg6[%c0_13, %c0_14] : memref<8x10xf32, #tpu.memory_space<vmem>>, vector<8x10xf32>
    tpu.vector_store %arg6[%c0_13, %c0_14], %22 {strides = array<i32>} : memref<8x10xf32, #tpu.memory_space<vmem>>, vector<8x10xf32>,
    return
  }
  func.func @transform_0(%arg0: i32) -> (i32, i32) {
    %c0_i32 = arith.constant 0 : i32
    %c0_i32_0 = arith.constant 0 : i32
    return %arg0, %c0_i32 : i32, i32
  }
  func.func @transform_1(%arg0: i32) -> (i32, i32) {
    %c0_i32 = arith.constant 0 : i32
    %c0_i32_0 = arith.constant 0 : i32
    %c0_i32_1 = arith.constant 0 : i32
    return %c0_i32, %c0_i32_0 : i32, i32
  }
  func.func @transform_2(%arg0: i32) -> (i32, i32) {
    %c0_i32 = arith.constant 0 : i32
    %c0_i32_0 = arith.constant 0 : i32
    %c0_i32_1 = arith.constant 0 : i32
    return %c0_i32, %c0_i32_0 : i32, i32
  }
  func.func @transform_3(%arg0: i32) -> (i32, i32) {
    %c0_i32 = arith.constant 0 : i32
    %c0_i32_0 = arith.constant 0 : i32
    %c0_i32_1 = arith.constant 0 : i32
    return %c0_i32, %c0_i32_0 : i32, i32
  }
  func.func @transform_4(%arg0: i32) -> (i32, i32) {
    %c0_i32 = arith.constant 0 : i32
    %c0_i32_0 = arith.constant 0 : i32
    %c0_i32_1 = arith.constant 0 : i32
    return %c0_i32, %c0_i32_0 : i32, i32
  }
  func.func @transform_5(%arg0: i32) -> (i32, i32) {
    %c0_i32 = arith.constant 0 : i32
    %c0_i32_0 = arith.constant 0 : i32
    return %arg0, %c0_i32 : i32, i32
  }
}

</mosaic_0001>

<bundles_post_ra>
// kernel: tpu_custom_call.1
= control target key start
LH: loop header
LB: loop body
LE: loop exit
PB: predicated region body
PF: predicated region fallthrough
CT: control target
= control target key end

     0   :  { %10 = vsyncpa [#allocation3], 0  ;;  %s1729_s0 = inlined_call_operand.vmem [shape: f32[16,896], index: 0, kind: input, shape index: {}]   ;;  %s1730_s1 = inlined_call_operand.hbm [shape: f32[896,256], index: 1, kind: input, shape index: {}]   ;;  %s1731_s2 = inlined_call_operand.vmem [shape: f32[1,256], index: 2, kind: input, shape index: {}]   ;;  %s1732_s3 = inlined_call_operand.vmem [shape: f32[256,10], index: 3, kind: input, shape index: {}]   ;;  %s1733_s4 = inlined_call_operand.vmem [shape: f32[1,10], index: 4, kind: input, shape index: {}]   ;;  %s1734_s5 = inlined_call_operand.hbm [shape: f32[16,10], index: 5, kind: output, shape index: {}]  }
   0x1   :  { %11 = vsyncpa [#allocation4], 0 }
   0x2   :  { %13 = vsyncpa [#allocation4 + $0x1], 0  ;;  %s1475_s18 = smov 0   ;;  %s1477_s19 = smov 0  }
   0x3   :  { %s1479_s20 = smov 0   ;;  %s1481_s21 = smov 0  }
   0x4 LB: > { %s1496_s22 = sadd.s32 4294967295, %s1438_s21   ;;  %s974_s23 = sadd.s32 4294967294, %s1438_s21   ;;  %s1438_s21 = sphi %s1481_s21, %s1750_s21   ;;  %s1434_s20 = sphi %s1479_s20, %s1749_s20   ;;  %s1430_s19 = sphi %s1477_s19, %s1748_s19   ;;  %s1426_s18 = sphi %s1475_s18, %s1747_s18  }
   0x5   : > { %s1500_s24 = sadd.s32 1, %s1438_s21   ;;  %s136_s25 = sadd.s32 1, %s1434_s20 }
   0x6   : > { %s133_s26 = ssub.s32 %s1438_s21, %s1500_s24  ;;  %p146_p0 = scmp.ne.s32.totalorder %s1434_s20, %s1430_s19 }
   0x7   : > { %p134_p1 = scmp.eq.s32.totalorder %s133_s26, 0  ;;  %p147_p2 = scmp.eq.s32.totalorder %s1496_s22, 1 }
   0x8   : > { %p152_p3 = scmp.ne.s32.totalorder %s1430_s19, %s1426_s18  ;;  %p153_p4 = scmp.eq.s32.totalorder %s974_s23, 1 }
   0x9   : > { %s1511_s27 = scalar_select %p134_p1, %s1434_s20, %s136_s25  }
   0xa   : > { %p1513_p5 = por %p147_p2, %p146_p0  ;;  %p1517_p6 = por %p153_p4, %p152_p3 }
   0xb   : > { %p975_p7 = scmp.ge.s32.totalorder %s1438_s21, 1  ;;  %p160_p8 = scmp.lt.s32.totalorder %s1438_s21, 3 }
   0xc   : > { %s1738_s28 = scalar_select %p1513_p5, 1, 0 }
   0xd   : > { %s1739_s29 = scalar_select %p1517_p6, 1, 0 }
   0xe   : > { %p1735_p9 = scmp.eq.s32.totalorder %s1496_s22, 0  ;;  %p1524_p10 = pnand %p975_p7, %p160_p8 }
   0xf   : > { %s1440_s6 = smov [#allocation2]   ;;  %s1344_s11 = scalar_lea.hbm %s1730_s1, 28672 }
  0x10   : > { %s1740_s30 = scalar_select %p1524_p10, 1, 0 }
  0x11   : > { %s172_s7 = sshll.u32 %s1440_s6, 4  ;;  %p1293_p11 = pneg %p1524_p10  ;;  %s173_s7 = int_to_ptr.vmem [resolvable:$true] %s172_s7 }
  0x12   : > { %p1345_p13 = scmp.ne.s32.totalorder %s1730_s1, %s1344_s11  ;;  %p1351_p3 = scmp.lt.u32.totalorder %s1344_s11, %s1730_s1 }
  0x13   : > { %p1532_p12 = pnand %p1735_p9, %p1293_p11 }
  0x15   : > { %p1346_p0 = pneg %p1532_p12 }
  0x17   : > { %p1347_p1 = pnand %p1346_p0, %p1345_p13 }
  0x19   : > { %p1348_p2 = pneg %p1347_p1 }
  0x1b   : > { %p1353_p4 = pnand %p1351_p3, %p1348_p2 }
  0x1d   : > { %1356 = shalt.err (!%p1353_p4)
}
  0x1e   : > { %s1357_s16 = scalar_lea.vmem %s173_s7, 28672  ;;  %p1365_p9 = scmp.lt.s32.totalorder %s173_s7, %s173_s7 }
  0x1f   : > { %p1358_p7 = scmp.ne.s32.totalorder %s173_s7, %s1357_s16  ;;  %p1366_p6 = scmp.lt.s32.totalorder %s1357_s16, %s1357_s16 }
  0x21   : > { %p1360_p8 = pnand %p1358_p7, %p1346_p0  ;;  %p1367_p5 = por %p1366_p6, %p1365_p9 }
  0x23   : > { %p1361_p11 = pneg %p1360_p8 }
  0x25   : > { %p1368_p10 = pnand %p1367_p5, %p1361_p11 }
  0x27   : > { %1371 = shalt.err (!%p1368_p10)
}
  0x28   : > { %s1441_s17 = smov 256   ;;  %s1442_s23 = smov 16  }
  0x29   : > { %1296 = dma.hbm_to_vmem [thread:$0]  (!%p1532_p12), %s1730_s1, 28672, %s173_s7, [#allocation3], %s1441_s17, %s1441_s17, %s1442_s23  }
  0x2a   : > { %p1742_p13 = scmp.ne.s32.totalorder %s1740_s30, 0 }
  0x2b   : > { %p1743_p1 = scmp.eq.s32.totalorder (!%p1742_p13), %s1496_s22, 0 }
  0x2c   : > { %205 = sbr.rel (%p1742_p13) target bundleno = 948 (0x3b4), region = 40 }
  0x33   : > { %1417 = dma.done.wait (%p1743_p1), [#allocation3], 28672   ;;  %p1744_p0 = pmov %p1743_p1 }
  0x34   : > { %v310_v0 = vld [vmem:[#allocation2 + $0x208] sm:$0xff]  ;;  %v312_v1 = vld [vmem:[#allocation2 + $0x218] sm:$0xff]  ;;  %v309_v2 = vld [vmem:[#allocation2 + $0x200] sm:$0xff]  ;;  %p233_p5 = scmp.lt.s32.totalorder %s1496_s22, 1  ;;  %vm876_vm0 = vcmask 80896   ;;  %s230_s14 = sand.u32 1, %s1430_s19  }
  0x35   : > { %1419 = vsyncadd (%p1744_p0), [#allocation3], 4294938624  ;;  %v1086_v3 = vpack.c.bf16 %v312_v1, %v310_v0  ;;  %v311_v4 = vld [vmem:[#allocation2 + $0x210] sm:$0xff]  ;;  %v314_v5 = vld [vmem:[#allocation2 + $0x228] sm:$0xff]  ;;  %s980_s15 = sshll.u32 %s230_s14, 3  ;;  %s984_s16 = sshll.u32 %s1496_s22, 7 }
  0x36   : > { %v316_v6 = vld [vmem:[#allocation2 + $0x238] sm:$0xff]  ;;  %v1088_v7 = vpack.c.bf16 %v311_v4, %v309_v2  ;;  %v313_v9 = vld [vmem:[#allocation2 + $0x220] sm:$0xff]  ;;  %v315_v10 = vld [vmem:[#allocation2 + $0x230] sm:$0xff]  ;;  %s1562_s30 = scalar_select %p233_p5, %s1496_s22, 1 }
  0x37   : > { %v1090_v8 = vpack.c.bf16 %v316_v6, %v314_v5  ;;  %v318_v11 = vld [vmem:[#allocation2 + $0x248] sm:$0xff]  ;;  %1087 = vmatprep.subr.bf16.mxu0 %v1086_v3  ;;  %v320_v12 = vld [vmem:[#allocation2 + $0x258] sm:$0xff]  ;;  %v1092_v13 = vpack.c.bf16 %v315_v10, %v313_v9  ;;  %v317_v15 = vld [vmem:[#allocation2 + $0x240] sm:$0xff]  ;;  %s232_s17 = scalar_lea.vmem [#allocation5], %s980_s15  ;;  %p1745_p9 = scmp.ne.s32.totalorder %s1738_s28, 0 }
  0x38   : > { %1089 = vmatpush1.bf16.msra.mxu0 %v1088_v7  ;;  %v1094_v14 = vpack.c.bf16 %v320_v12, %v318_v11  ;;  %v319_v16 = vld [vmem:[#allocation2 + $0x250] sm:$0xff]  ;;  %v322_v17 = vld [vmem:[#allocation2 + $0x268] sm:$0xff]  ;;  %v324_v18 = vld [vmem:[#allocation2 + $0x278] sm:$0xff]  ;;  %s1286_s6 = smul.u32 56, %s1562_s30  ;;  %s903_s23 = sshll.u32 %s232_s17, 4  ;;  %s1688_s23 = int_to_ptr.vmem [resolvable:$true] %s903_s23 }
  0x39   : > { %1091 = vmatprep.subr.bf16.mxu0 %v1090_v8  ;;  %v1096_v19 = vpack.c.bf16 %v319_v16, %v317_v15  ;;  %v1098_v20 = vpack.c.bf16 %v324_v18, %v322_v17  ;;  %v321_v21 = vld [vmem:[#allocation2 + $0x260] sm:$0xff]  ;;  %v323_v22 = vld [vmem:[#allocation2 + $0x270] sm:$0xff]  ;;  %v326_v23 = vld [vmem:[#allocation2 + $0x288] sm:$0xff]  ;;  %s1686_s30 = scalar_lea.hbm %s1734_s5, %s984_s16  ;;  %s1372_s7 = scalar_lea.vmem %s1688_s23, 128 }
  0x3a   : > { %v328_v24 = vld [vmem:[#allocation2 + $0x298] sm:$0xff]  ;;  %v246_v25 = vld [vmem:[#allocation2 + $0x8] sm:$0xff]  ;;  %v1100_v27 = vpack.c.bf16 %v323_v22, %v321_v21  ;;  %v325_v28 = vld [vmem:[#allocation2 + $0x280] sm:$0xff]  ;;  %s1568_s9 = scalar_lea.vmem %s1729_s0, %s1286_s6  ;;  %s890_s6 = scalar_lea.sflag [#allocation4], %s230_s14 }
  0x3b   : > { %v248_v26 = vld [vmem:[#allocation2 + $0x18] sm:$0xff]  ;;  %v245_v30 = vld [vmem:[#allocation2] sm:$0xff]  ;;  %v1102_v31 = vpack.c.bf16 %v328_v24, %v326_v23  ;;  %v327_v32 = vld [vmem:[#allocation2 + $0x290] sm:$0xff]  ;;  %p1373_p6 = scmp.ne.s32.totalorder %s1688_s23, %s1372_s7  ;;  %s1444_s22 = smov [#allocation5]  }
  0x3c   : > { %1093 = vmatpush1.bf16.msra.mxu0 %v1092_v13  ;;  %v1022_v29 = vpack.c.bf16 %v248_v26, %v246_v25  ;;  %v330_v33 = vld [vmem:[#allocation2 + $0x2a8] sm:$0xff]  ;;  %v247_v34 = vld [vmem:[#allocation2 + $0x10] sm:$0xff]  ;;  %v332_v35 = vld [vmem:[#allocation2 + $0x2b8] sm:$0xff]  ;;  %v1104_v42 = vpack.c.bf16 %v327_v32, %v325_v28  ;;  %s1376_s8 = sshll.u32 %s1444_s22, 4  ;;  %s1377_s8 = int_to_ptr.vmem [resolvable:$false] %s1376_s8 }
  0x3d   : > { %1095 = vmatprep.subr.bf16.mxu0 %v1094_v14  ;;  %v1024_v36 = vpack.c.bf16 %v247_v34, %v245_v30  ;;  %v250_v37 = vld [vmem:[#allocation2 + $0x28] sm:$0xff]  ;;  %v252_v38 = vld [vmem:[#allocation2 + $0x38] sm:$0xff]  ;;  %v249_v40 = vld [vmem:[#allocation2 + $0x20] sm:$0xff]  ;;  %v1106_v46 = vpack.c.bf16 %v332_v35, %v330_v33  ;;  %p1374_p10 = pnand %p1373_p6, %p1745_p9  ;;  %p1379_p2 = scmp.lt.s32.totalorder %s1688_s23, %s1377_s8 }
  0x3e   : > { %1023 = vmatprep.subr.bf16.mxu1 %v1022_v29  ;;  %v1026_v39 = vpack.c.bf16 %v252_v38, %v250_v37  ;;  %v251_v41 = vld [vmem:[#allocation2 + $0x30] sm:$0xff]  ;;  %v329_v43 = vld [vmem:[#allocation2 + $0x2a0] sm:$0xff]  ;;  %v254_v45 = vld [vmem:[#allocation2 + $0x48] sm:$0xff] }
  0x3f   : > { %1025 = vmatpush1.bf16.msra.mxu1 %v1024_v36  ;;  %v1028_v44 = vpack.c.bf16 %v251_v41, %v249_v40  ;;  %v331_v47 = vld [vmem:[#allocation2 + $0x2b0] sm:$0xff]  ;;  %v334_v48 = vld [vmem:[#allocation2 + $0x2c8] sm:$0xff]  ;;  %v256_v49 = vld [vmem:[#allocation2 + $0x58] sm:$0xff]  ;;  %p1375_p12 = pneg %p1374_p10 }
  0x40   : > { %1097 = vmatpush1.bf16.msra.mxu0 %v1096_v19  ;;  %1027 = vmatprep.subr.bf16.mxu1 %v1026_v39  ;;  %v336_v50 = vld [vmem:[#allocation2 + $0x2d8] sm:$0xff]  ;;  %v1030_v51 = vpack.c.bf16 %v256_v49, %v254_v45  ;;  %v253_v52 = vld [vmem:[#allocation2 + $0x40] sm:$0xff]  ;;  %v255_v53 = vld [vmem:[#allocation2 + $0x50] sm:$0xff]  ;;  %v1108_v56 = vpack.c.bf16 %v331_v47, %v329_v43 }
  0x41   : > { %1099 = vmatprep.subr.bf16.mxu0 %v1098_v20  ;;  %v258_v54 = vld [vmem:[#allocation2 + $0x68] sm:$0xff]  ;;  %v260_v55 = vld [vmem:[#allocation2 + $0x78] sm:$0xff]  ;;  %v333_v57 = vld [vmem:[#allocation2 + $0x2c0] sm:$0xff]  ;;  %v1032_v59 = vpack.c.bf16 %v255_v53, %v253_v52  ;;  %v1110_v60 = vpack.c.bf16 %v336_v50, %v334_v48 }
  0x42   : > { %v335_v58 = vld [vmem:[#allocation2 + $0x2d0] sm:$0xff]  ;;  %v338_v61 = vld [vmem:[#allocation2 + $0x2e8] sm:$0xff]  ;;  %v1034_v62 = vpack.c.bf16 %v260_v55, %v258_v54  ;;  %v257_v63 = vld [vmem:[#allocation2 + $0x60] sm:$0xff] }
  0x43   : > { %1029 = vmatpush1.bf16.msra.mxu1 %v1028_v44  ;;  %v259_v0 = vld [vmem:[#allocation2 + $0x70] sm:$0xff]  ;;  %v340_v1 = vld [vmem:[#allocation2 + $0x2f8] sm:$0xff]  ;;  %v262_v2 = vld [vmem:[#allocation2 + $0x88] sm:$0xff]  ;;  %v1112_v4 = vpack.c.bf16 %v335_v58, %v333_v57 }
  0x44   : > { %1101 = vmatpush1.bf16.msra.mxu0 %v1100_v27  ;;  %1031 = vmatprep.subr.bf16.mxu1 %v1030_v51  ;;  %v264_v3 = vld [vmem:[#allocation2 + $0x98] sm:$0xff]  ;;  %v337_v5 = vld [vmem:[#allocation2 + $0x2e0] sm:$0xff]  ;;  %v339_v6 = vld [vmem:[#allocation2 + $0x2f0] sm:$0xff]  ;;  %v1036_v7 = vpack.c.bf16 %v259_v0, %v257_v63  ;;  %v1114_v8 = vpack.c.bf16 %v340_v1, %v338_v61 }
  0x45   : > { %1103 = vmatprep.subr.bf16.mxu0 %v1102_v31  ;;  %v342_v9 = vld [vmem:[#allocation2 + $0x308] sm:$0xff]  ;;  %v1038_v10 = vpack.c.bf16 %v264_v3, %v262_v2  ;;  %v261_v11 = vld [vmem:[#allocation2 + $0x80] sm:$0xff]  ;;  %v263_v12 = vld [vmem:[#allocation2 + $0x90] sm:$0xff]  ;;  %v1116_v16 = vpack.c.bf16 %v339_v6, %v337_v5 }
  0x46   : > { %v344_v13 = vld [vmem:[#allocation2 + $0x318] sm:$0xff]  ;;  %v266_v14 = vld [vmem:[#allocation2 + $0xa8] sm:$0xff]  ;;  %v341_v17 = vld [vmem:[#allocation2 + $0x300] sm:$0xff]  ;;  %v1040_v19 = vpack.c.bf16 %v263_v12, %v261_v11 }
  0x47   : > { %1033 = vmatpush1.bf16.msra.mxu1 %v1032_v59  ;;  %v268_v15 = vld [vmem:[#allocation2 + $0xb8] sm:$0xff]  ;;  %v343_v18 = vld [vmem:[#allocation2 + $0x310] sm:$0xff]  ;;  %v1118_v20 = vpack.c.bf16 %v344_v13, %v342_v9  ;;  %v346_v21 = vld [vmem:[#allocation2 + $0x328] sm:$0xff] }
  0x48   : > { %1105 = vmatpush1.bf16.msra.mxu0 %v1104_v42  ;;  %1035 = vmatprep.subr.bf16.mxu1 %v1034_v62  ;;  %v1042_v22 = vpack.c.bf16 %v268_v15, %v266_v14  ;;  %v265_v23 = vld [vmem:[#allocation2 + $0xa0] sm:$0xff]  ;;  %v267_v24 = vld [vmem:[#allocation2 + $0xb0] sm:$0xff]  ;;  %v348_v25 = vld [vmem:[#allocation2 + $0x338] sm:$0xff]  ;;  %v1120_v28 = vpack.c.bf16 %v343_v18, %v341_v17 }
  0x49   : > { %1107 = vmatprep.subr.bf16.mxu0 %v1106_v46  ;;  %v270_v26 = vld [vmem:[#allocation2 + $0xc8] sm:$0xff]  ;;  %v272_v27 = vld [vmem:[#allocation2 + $0xd8] sm:$0xff]  ;;  %v345_v29 = vld [vmem:[#allocation2 + $0x320] sm:$0xff]  ;;  %v1044_v31 = vpack.c.bf16 %v267_v24, %v265_v23  ;;  %v1122_v33 = vpack.c.bf16 %v348_v25, %v346_v21 }
  0x4a   : > { %v347_v30 = vld [vmem:[#allocation2 + $0x330] sm:$0xff]  ;;  %v241_v32 = vld [vmem:[%s1568_s9 + $0x18] sm:$0xff]  ;;  %v350_v34 = vld [vmem:[#allocation2 + $0x348] sm:$0xff]  ;;  %v1046_v35 = vpack.c.bf16 %v272_v27, %v270_v26 }
  0x4b   : > { %1037 = vmatpush1.bf16.msra.mxu1 %v1036_v7  ;;  %v269_v36 = vld [vmem:[#allocation2 + $0xc0] sm:$0xff]  ;;  %v271_v37 = vld [vmem:[#allocation2 + $0xd0] sm:$0xff]  ;;  %v352_v38 = vld [vmem:[#allocation2 + $0x358] sm:$0xff]  ;;  %616 = vmatprep.mubr.f32.mxu0 %v241_v32  ;;  %v1124_v41 = vpack.c.bf16 %v347_v30, %v345_v29 }
  0x4c   : > { %1109 = vmatpush1.bf16.msra.mxu0 %v1108_v56  ;;  %1039 = vmatprep.subr.bf16.mxu1 %v1038_v10  ;;  %v274_v39 = vld [vmem:[#allocation2 + $0xe8] sm:$0xff]  ;;  %v276_v40 = vld [vmem:[#allocation2 + $0xf8] sm:$0xff]  ;;  %v349_v42 = vld [vmem:[#allocation2 + $0x340] sm:$0xff]  ;;  %v1048_v44 = vpack.c.bf16 %v271_v37, %v269_v36  ;;  %v1126_v45 = vpack.c.bf16 %v352_v38, %v350_v34 }
  0x4d   : > { %1111 = vmatprep.subr.bf16.mxu0 %v1110_v60  ;;  %v351_v43 = vld [vmem:[#allocation2 + $0x350] sm:$0xff]  ;;  %v354_v46 = vld [vmem:[#allocation2 + $0x368] sm:$0xff]  ;;  %v1050_v47 = vpack.c.bf16 %v276_v40, %v274_v39  ;;  %v273_v48 = vld [vmem:[#allocation2 + $0xe0] sm:$0xff] }
  0x4e   : > { %v275_v49 = vld [vmem:[#allocation2 + $0xf0] sm:$0xff]  ;;  %v356_v50 = vld [vmem:[#allocation2 + $0x378] sm:$0xff]  ;;  %v278_v51 = vld [vmem:[#allocation2 + $0x108] sm:$0xff]  ;;  %v1128_v53 = vpack.c.bf16 %v351_v43, %v349_v42 }
  0x4f   : > { %1041 = vmatpush1.bf16.msra.mxu1 %v1040_v19  ;;  %v280_v52 = vld [vmem:[#allocation2 + $0x118] sm:$0xff]  ;;  %v353_v54 = vld [vmem:[#allocation2 + $0x360] sm:$0xff]  ;;  %v355_v55 = vld [vmem:[#allocation2 + $0x370] sm:$0xff]  ;;  %v1052_v56 = vpack.c.bf16 %v275_v49, %v273_v48  ;;  %v1130_v57 = vpack.c.bf16 %v356_v50, %v354_v46 }
  0x50   : > { %1113 = vmatpush1.bf16.msra.mxu0 %v1112_v4  ;;  %1043 = vmatprep.subr.bf16.mxu1 %v1042_v22  ;;  %v358_v58 = vld [vmem:[#allocation2 + $0x388] sm:$0xff]  ;;  %v1054_v59 = vpack.c.bf16 %v280_v52, %v278_v51  ;;  %v277_v60 = vld [vmem:[#allocation2 + $0x100] sm:$0xff]  ;;  %v279_v61 = vld [vmem:[#allocation2 + $0x110] sm:$0xff]  ;;  %v1132_v1 = vpack.c.bf16 %v355_v55, %v353_v54 }
  0x51   : > { %1115 = vmatprep.subr.bf16.mxu0 %v1114_v8  ;;  %v360_v62 = vld [vmem:[#allocation2 + $0x398] sm:$0xff]  ;;  %v282_v63 = vld [vmem:[#allocation2 + $0x128] sm:$0xff]  ;;  %v357_v2 = vld [vmem:[#allocation2 + $0x380] sm:$0xff]  ;;  %v1056_v4 = vpack.c.bf16 %v279_v61, %v277_v60 }
  0x52   : > { %v284_v0 = vld [vmem:[#allocation2 + $0x138] sm:$0xff]  ;;  %v359_v3 = vld [vmem:[#allocation2 + $0x390] sm:$0xff]  ;;  %v1134_v5 = vpack.c.bf16 %v360_v62, %v358_v58  ;;  %v362_v6 = vld [vmem:[#allocation2 + $0x3a8] sm:$0xff] }
  0x53   : > { %1045 = vmatpush1.bf16.msra.mxu1 %v1044_v31  ;;  %v1058_v7 = vpack.c.bf16 %v284_v0, %v282_v63  ;;  %v281_v8 = vld [vmem:[#allocation2 + $0x120] sm:$0xff]  ;;  %v283_v9 = vld [vmem:[#allocation2 + $0x130] sm:$0xff]  ;;  %v364_v10 = vld [vmem:[#allocation2 + $0x3b8] sm:$0xff]  ;;  %v1136_v13 = vpack.c.bf16 %v359_v3, %v357_v2 }
  0x54   : > { %1117 = vmatpush1.bf16.msra.mxu0 %v1116_v16  ;;  %1047 = vmatprep.subr.bf16.mxu1 %v1046_v35  ;;  %v286_v11 = vld [vmem:[#allocation2 + $0x148] sm:$0xff]  ;;  %v288_v12 = vld [vmem:[#allocation2 + $0x158] sm:$0xff]  ;;  %v361_v14 = vld [vmem:[#allocation2 + $0x3a0] sm:$0xff]  ;;  %v1060_v16 = vpack.c.bf16 %v283_v9, %v281_v8  ;;  %v1138_v17 = vpack.c.bf16 %v364_v10, %v362_v6 }
  0x55   : > { %1119 = vmatprep.subr.bf16.mxu0 %v1118_v20  ;;  %v363_v15 = vld [vmem:[#allocation2 + $0x3b0] sm:$0xff]  ;;  %v366_v18 = vld [vmem:[#allocation2 + $0x3c8] sm:$0xff]  ;;  %v1062_v19 = vpack.c.bf16 %v288_v12, %v286_v11  ;;  %v285_v20 = vld [vmem:[#allocation2 + $0x140] sm:$0xff] }
  0x56   : > { %v287_v21 = vld [vmem:[#allocation2 + $0x150] sm:$0xff]  ;;  %v368_v22 = vld [vmem:[#allocation2 + $0x3d8] sm:$0xff]  ;;  %v290_v23 = vld [vmem:[#allocation2 + $0x168] sm:$0xff]  ;;  %v1140_v25 = vpack.c.bf16 %v363_v15, %v361_v14 }
  0x57   : > { %1049 = vmatpush1.bf16.msra.mxu1 %v1048_v44  ;;  %v292_v24 = vld [vmem:[#allocation2 + $0x178] sm:$0xff]  ;;  %v365_v26 = vld [vmem:[#allocation2 + $0x3c0] sm:$0xff]  ;;  %v367_v27 = vld [vmem:[#allocation2 + $0x3d0] sm:$0xff]  ;;  %v1064_v29 = vpack.c.bf16 %v287_v21, %v285_v20  ;;  %v1142_v30 = vpack.c.bf16 %v368_v22, %v366_v18 }
  0x58   : > { %1121 = vmatpush1.bf16.msra.mxu0 %v1120_v28  ;;  %1051 = vmatprep.subr.bf16.mxu1 %v1050_v47  ;;  %v370_v28 = vld [vmem:[#allocation2 + $0x3e8] sm:$0xff]  ;;  %v372_v31 = vld [vmem:[#allocation2 + $0x3f8] sm:$0xff]  ;;  %v1066_v32 = vpack.c.bf16 %v292_v24, %v290_v23  ;;  %v291_v34 = vld [vmem:[#allocation2 + $0x170] sm:$0xff]  ;;  %v1144_v38 = vpack.c.bf16 %v367_v27, %v365_v26 }
  0x59   : > { %1123 = vmatprep.subr.bf16.mxu0 %v1122_v33  ;;  %v289_v33 = vld [vmem:[#allocation2 + $0x160] sm:$0xff]  ;;  %v294_v35 = vld [vmem:[#allocation2 + $0x188] sm:$0xff]  ;;  %v296_v36 = vld [vmem:[#allocation2 + $0x198] sm:$0xff]  ;;  %v1146_v42 = vpack.c.bf16 %v372_v31, %v370_v28 }
  0x5a   : > { %v239_v37 = vld [vmem:[%s1568_s9 + $0x8] sm:$0xff]  ;;  %v369_v39 = vld [vmem:[#allocation2 + $0x3e0] sm:$0xff]  ;;  %v371_v40 = vld [vmem:[#allocation2 + $0x3f0] sm:$0xff]  ;;  %v1070_v44 = vpack.c.bf16 %v296_v36, %v294_v35 }
  0x5b   : > { %1053 = vmatpush1.bf16.msra.mxu1 %v1052_v56  ;;  %545 = vmatprep.mubr.f32.mxu1 %v239_v37  ;;  %v374_v43 = vld [vmem:[#allocation2 + $0x408] sm:$0xff]  ;;  %v295_v46 = vld [vmem:[#allocation2 + $0x190] sm:$0xff]  ;;  %v376_v47 = vld [vmem:[#allocation2 + $0x418] sm:$0xff]  ;;  %v1148_v50 = vpack.c.bf16 %v371_v40, %v369_v39 }
  0x5c   : > { %1125 = vmatpush1.bf16.msra.mxu0 %v1124_v41  ;;  %1055 = vmatprep.subr.bf16.mxu1 %v1054_v59  ;;  %v1068_v41 = vpack.c.bf16 %v291_v34, %v289_v33  ;;  %v298_v48 = vld [vmem:[#allocation2 + $0x1a8] sm:$0xff]  ;;  %v300_v49 = vld [vmem:[#allocation2 + $0x1b8] sm:$0xff]  ;;  %v373_v51 = vld [vmem:[#allocation2 + $0x400] sm:$0xff]  ;;  %v1150_v54 = vpack.c.bf16 %v376_v47, %v374_v43 }
  0x5d   : > { %1127 = vmatprep.subr.bf16.mxu0 %v1126_v45  ;;  %v293_v45 = vld [vmem:[#allocation2 + $0x180] sm:$0xff]  ;;  %v375_v52 = vld [vmem:[#allocation2 + $0x410] sm:$0xff]  ;;  %v378_v55 = vld [vmem:[#allocation2 + $0x428] sm:$0xff]  ;;  %v1074_v56 = vpack.c.bf16 %v300_v49, %v298_v48 }
  0x5e   : > { %v299_v58 = vld [vmem:[#allocation2 + $0x1b0] sm:$0xff]  ;;  %v380_v59 = vld [vmem:[#allocation2 + $0x438] sm:$0xff]  ;;  %v302_v60 = vld [vmem:[#allocation2 + $0x1c8] sm:$0xff]  ;;  %v1152_v63 = vpack.c.bf16 %v375_v52, %v373_v51 }
  0x5f   : > { %1057 = vmatpush1.bf16.msra.mxu1 %v1056_v4  ;;  %v304_v61 = vld [vmem:[#allocation2 + $0x1d8] sm:$0xff]  ;;  %v240_v62 = vld [vmem:[%s1568_s9 + $0x10] sm:$0xff]  ;;  %v377_v0 = vld [vmem:[#allocation2 + $0x420] sm:$0xff]  ;;  %v1154_v3 = vpack.c.bf16 %v380_v59, %v378_v55 }
  0x60   : > { %1129 = vmatpush1.bf16.msra.mxu0 %v1128_v53  ;;  %1059 = vmatprep.subr.bf16.mxu1 %v1058_v7  ;;  %v1072_v53 = vpack.c.bf16 %v295_v46, %v293_v45  ;;  %v382_v4 = vld [vmem:[#allocation2 + $0x448] sm:$0xff]  ;;  %v301_v6 = vld [vmem:[#allocation2 + $0x1c0] sm:$0xff]  ;;  %v303_v7 = vld [vmem:[#allocation2 + $0x1d0] sm:$0xff] }
  0x61   : > { %1131 = vmatprep.subr.bf16.mxu0 %v1130_v57  ;;  %v297_v57 = vld [vmem:[#allocation2 + $0x1a0] sm:$0xff]  ;;  %v384_v8 = vld [vmem:[#allocation2 + $0x458] sm:$0xff]  ;;  %v306_v9 = vld [vmem:[#allocation2 + $0x1e8] sm:$0xff]  ;;  %v1080_v14 = vpack.c.bf16 %v303_v7, %v301_v6 }
  0x62   : > { %v1076_v2 = vpack.c.bf16 %v299_v58, %v297_v57  ;;  %v308_v10 = vld [vmem:[#allocation2 + $0x1f8] sm:$0xff]  ;;  %v381_v12 = vld [vmem:[#allocation2 + $0x440] sm:$0xff]  ;;  %v1158_v15 = vpack.c.bf16 %v384_v8, %v382_v4  ;;  %v438_v21 = vld [vmem:[#allocation2 + $0x608] sm:$0xff] }
  0x63   : > { %1061 = vmatpush1.bf16.msra.mxu1 %v1060_v16  ;;  %v386_v16 = vld [vmem:[#allocation2 + $0x468] sm:$0xff]  ;;  %v305_v18 = vld [vmem:[#allocation2 + $0x1e0] sm:$0xff]  ;;  %v388_v20 = vld [vmem:[#allocation2 + $0x478] sm:$0xff] }
  0x64   : > { %1133 = vmatpush1.bf16.msra.mxu0 %v1132_v1  ;;  %1063 = vmatprep.subr.bf16.mxu1 %v1062_v19  ;;  %v379_v1 = vld [vmem:[#allocation2 + $0x430] sm:$0xff]  ;;  %v440_v22 = vld [vmem:[#allocation2 + $0x618] sm:$0xff]  ;;  %v385_v24 = vld [vmem:[#allocation2 + $0x460] sm:$0xff]  ;;  %v1162_v27 = vpack.c.bf16 %v388_v20, %v386_v16 }
  0x65   : > { %1135 = vmatprep.subr.bf16.mxu0 %v1134_v5  ;;  %v1078_v5 = vpack.c.bf16 %v304_v61, %v302_v60  ;;  %v1156_v11 = vpack.c.bf16 %v379_v1, %v377_v0  ;;  %v307_v19 = vld [vmem:[#allocation2 + $0x1f0] sm:$0xff]  ;;  %v390_v28 = vld [vmem:[#allocation2 + $0x488] sm:$0xff]  ;;  %v444_v34 = vld [vmem:[#allocation2 + $0x638] sm:$0xff]  ;;  %v1443_v61 = vmov 0.0  }
  0x66   : > { %v1084_v26 = vpack.c.bf16 %v307_v19, %v305_v18  ;;  %v439_v31 = vld [vmem:[#allocation2 + $0x610] sm:$0xff]  ;;  %v442_v33 = vld [vmem:[#allocation2 + $0x628] sm:$0xff]  ;;  %v389_v35 = vld [vmem:[#allocation2 + $0x480] sm:$0xff] }
  0x67   : > { %1065 = vmatpush1.bf16.msra.mxu1 %v1064_v29  ;;  %v1214_v29 = vpack.c.bf16 %v440_v22, %v438_v21  ;;  %v391_v37 = vld [vmem:[#allocation2 + $0x490] sm:$0xff]  ;;  %v243_v40 = vld [vmem:[%s1568_s9 + $0x28] sm:$0xff]  ;;  %v1218_v43 = vpack.c.bf16 %v444_v34, %v442_v33  ;;  %v396_v46 = vld [vmem:[#allocation2 + $0x4b8] sm:$0xff] }
  0x68   : > { %1137 = vmatpush1.bf16.msra.mxu0 %v1136_v13  ;;  %1067 = vmatprep.subr.bf16.mxu1 %v1066_v32  ;;  %v383_v13 = vld [vmem:[#allocation2 + $0x450] sm:$0xff]  ;;  %v392_v32 = vld [vmem:[#allocation2 + $0x498] sm:$0xff]  ;;  %v446_v47 = vld [vmem:[#allocation2 + $0x648] sm:$0xff]  ;;  %v1168_v49 = vpack.c.bf16 %v391_v37, %v389_v35 }
  0x69   : > { %1139 = vmatprep.subr.bf16.mxu0 %v1138_v17  ;;  %v1082_v17 = vpack.c.bf16 %v308_v10, %v306_v9  ;;  %v1160_v23 = vpack.c.bf16 %v383_v13, %v381_v12  ;;  %v443_v45 = vld [vmem:[#allocation2 + $0x630] sm:$0xff]  ;;  %v448_v48 = vld [vmem:[#allocation2 + $0x658] sm:$0xff]  ;;  %v450_v59 = vld [vmem:[#allocation2 + $0x668] sm:$0xff] }
  0x6a   : > { %v395_v51 = vld [vmem:[#allocation2 + $0x4b0] sm:$0xff]  ;;  %v1222_v55 = vpack.c.bf16 %v448_v48, %v446_v47  ;;  %v400_v58 = vld [vmem:[#allocation2 + $0x4d8] sm:$0xff]  ;;  %v454_v8 = vld [vmem:[#allocation2 + $0x688] sm:$0xff] }
  0x6b   : > { %1069 = vmatpush1.bf16.msra.mxu1 %v1068_v41  ;;  %v1166_v41 = vpack.c.bf16 %v392_v32, %v390_v28  ;;  %v447_v57 = vld [vmem:[#allocation2 + $0x650] sm:$0xff]  ;;  %v452_v60 = vld [vmem:[#allocation2 + $0x678] sm:$0xff]  ;;  %v458_v20 = vld [vmem:[#allocation2 + $0x6a8] sm:$0xff] }
  0x6c   : > { %1141 = vmatpush1.bf16.msra.mxu0 %v1140_v25  ;;  %1071 = vmatprep.subr.bf16.mxu1 %v1070_v44  ;;  %v387_v25 = vld [vmem:[#allocation2 + $0x470] sm:$0xff]  ;;  %v441_v44 = vld [vmem:[#allocation2 + $0x620] sm:$0xff]  ;;  %v1226_v4 = vpack.c.bf16 %v452_v60, %v450_v59  ;;  %v404_v7 = vld [vmem:[#allocation2 + $0x4f8] sm:$0xff] }
  0x6d   : > { %1143 = vmatprep.subr.bf16.mxu0 %v1142_v30  ;;  %v437_v30 = vld [vmem:[#allocation2 + $0x600] sm:$0xff]  ;;  %v1164_v36 = vpack.c.bf16 %v387_v25, %v385_v24  ;;  %v1220_v52 = vpack.c.bf16 %v443_v45, %v441_v44  ;;  %v399_v0 = vld [vmem:[#allocation2 + $0x4d0] sm:$0xff]  ;;  %v456_v9 = vld [vmem:[#allocation2 + $0x698] sm:$0xff] }
  0x6e   : > { %v1216_v39 = vpack.c.bf16 %v439_v31, %v437_v30  ;;  %v451_v6 = vld [vmem:[#allocation2 + $0x670] sm:$0xff]  ;;  %v1230_v16 = vpack.c.bf16 %v456_v9, %v454_v8  ;;  %v408_v19 = vld [vmem:[#allocation2 + $0x518] sm:$0xff]  ;;  %v462_v32 = vld [vmem:[#allocation2 + $0x6c8] sm:$0xff] }
  0x6f   : > { %1073 = vmatpush1.bf16.msra.mxu1 %v1072_v53  ;;  %v403_v12 = vld [vmem:[#allocation2 + $0x4f0] sm:$0xff]  ;;  %v460_v21 = vld [vmem:[#allocation2 + $0x6b8] sm:$0xff]  ;;  %v409_v35 = vld [vmem:[#allocation2 + $0x520] sm:$0xff] }
  0x70   : > { %1145 = vmatpush1.bf16.msra.mxu0 %v1144_v38  ;;  %1075 = vmatprep.subr.bf16.mxu1 %v1074_v56  ;;  %v238_v38 = vld [vmem:[%s1568_s9] sm:$0xff]  ;;  %v455_v18 = vld [vmem:[#allocation2 + $0x690] sm:$0xff]  ;;  %v1234_v28 = vpack.c.bf16 %v460_v21, %v458_v20  ;;  %v412_v31 = vld [vmem:[#allocation2 + $0x538] sm:$0xff] }
  0x71   : > { %1147 = vmatprep.subr.bf16.mxu0 %v1146_v42  ;;  %v394_v42 = vld [vmem:[#allocation2 + $0x4a8] sm:$0xff]  ;;  %v445_v56 = vld [vmem:[#allocation2 + $0x640] sm:$0xff]  ;;  %v407_v24 = vld [vmem:[#allocation2 + $0x510] sm:$0xff] }
  0x72   : > { %v1170_v53 = vpack.c.bf16 %v396_v46, %v394_v42  ;;  %v1224_v1 = vpack.c.bf16 %v447_v57, %v445_v56  ;;  %v459_v30 = vld [vmem:[#allocation2 + $0x6b0] sm:$0xff]  ;;  %v464_v33 = vld [vmem:[#allocation2 + $0x6d8] sm:$0xff]  ;;  %v466_v44 = vld [vmem:[#allocation2 + $0x6e8] sm:$0xff] }
  0x73   : > { %1077 = vmatpush1.bf16.msra.mxu1 %v1076_v2  ;;  %v463_v42 = vld [vmem:[#allocation2 + $0x6d0] sm:$0xff]  ;;  %v468_v45 = vld [vmem:[#allocation2 + $0x6f8] sm:$0xff]  ;;  %v413_v47 = vld [vmem:[#allocation2 + $0x540] sm:$0xff] }
  0x74   : > { %1149 = vmatpush1.bf16.msra.mxu0 %v1148_v50  ;;  %1079 = vmatprep.subr.bf16.mxu1 %v1078_v5  ;;  %v393_v50 = vld [vmem:[#allocation2 + $0x4a0] sm:$0xff]  ;;  %v419_v60 = vld [vmem:[#allocation2 + $0x570] sm:$0xff] }
  0x75   : > { %1151 = vmatprep.subr.bf16.mxu0 %v1150_v54  ;;  %v398_v54 = vld [vmem:[#allocation2 + $0x4c8] sm:$0xff]  ;;  %v449_v5 = vld [vmem:[#allocation2 + $0x660] sm:$0xff]  ;;  %v427_v9 = vld [vmem:[#allocation2 + $0x5b0] sm:$0xff] }
  0x76   : > { %v1174_v2 = vpack.c.bf16 %v400_v58, %v398_v54  ;;  %v1228_v13 = vpack.c.bf16 %v451_v6, %v449_v5  ;;  %v418_v54 = vld [vmem:[#allocation2 + $0x568] sm:$0xff]  ;;  %v417_v59 = vld [vmem:[#allocation2 + $0x560] sm:$0xff]  ;;  %v428_v5 = vld [vmem:[#allocation2 + $0x5b8] sm:$0xff] }
  0x77   : > { %617 = vmatmul.mubr.f32.vlgmr.msra.gmra.mrb[0].mxu0 %v240_v62  ;;  %1081 = vmatpush1.bf16.msra.mxu1 %v1080_v14  ;;  %v1172_v62 = vpack.c.bf16 %v395_v51, %v393_v50  ;;  %v415_v50 = vld [vmem:[#allocation2 + $0x550] sm:$0xff]  ;;  %v1242_v51 = vpack.c.bf16 %v468_v45, %v466_v44  ;;  %v425_v8 = vld [vmem:[#allocation2 + $0x5a0] sm:$0xff] }
  0x78   : > { %1153 = vmatpush1.bf16.msra.mxu0 %v1152_v63  ;;  %1083 = vmatprep.subr.bf16.mxu1 %v1082_v17  ;;  %v397_v63 = vld [vmem:[#allocation2 + $0x4c0] sm:$0xff]  ;;  %v1192_v56 = vpack.c.bf16 %v415_v50, %v413_v47  ;;  %v435_v21 = vld [vmem:[#allocation2 + $0x5f0] sm:$0xff] }
  0x79   : > { %1155 = vmatprep.subr.bf16.mxu0 %v1154_v3  ;;  %687 = vmatprep.mubr.f32.mxu0 %v243_v40  ;;  %v402_v3 = vld [vmem:[#allocation2 + $0x4e8] sm:$0xff]  ;;  %v1176_v10 = vpack.c.bf16 %v399_v0, %v397_v63  ;;  %v453_v17 = vld [vmem:[#allocation2 + $0x680] sm:$0xff]  ;;  %v1238_v40 = vpack.c.bf16 %v464_v33, %v462_v32  ;;  %v1196_v63 = vpack.c.bf16 %v419_v60, %v417_v59  ;;  %v244_v0 = vld [vmem:[%s1568_s9 + $0x30] sm:$0xff] }
  0x7a   : > { %v1178_v14 = vpack.c.bf16 %v404_v7, %v402_v3  ;;  %v1232_v25 = vpack.c.bf16 %v455_v18, %v453_v17  ;;  %v423_v3 = vld [vmem:[#allocation2 + $0x590] sm:$0xff]  ;;  %v436_v17 = vld [vmem:[#allocation2 + $0x5f8] sm:$0xff]  ;;  %v433_v20 = vld [vmem:[#allocation2 + $0x5e0] sm:$0xff] }
  0x7b   : > { %1085 = vmatpush1.bf16.msra.mxu1 %v1084_v26  ;;  %v769_v33 = vld [vmem:[%s1732_s3 + $0x10] sm:$0xff]  ;;  %v791_v47 = vld [vmem:[%s1732_s3 + $0xc0] sm:$0xff] }
  0x7c   : > { %1157 = vmatpush1.bf16.msra.mxu0 %v1156_v11  ;;  %1215 = vmatprep.subr.bf16.mxu1 %v1214_v29  ;;  %v401_v11 = vld [vmem:[#allocation2 + $0x4e0] sm:$0xff]  ;;  %v773_v45 = vld [vmem:[%s1732_s3 + $0x30] sm:$0xff] }
  0x7d   : > { %1159 = vmatprep.subr.bf16.mxu0 %v1158_v15  ;;  %v406_v15 = vld [vmem:[#allocation2 + $0x508] sm:$0xff]  ;;  %v1180_v22 = vpack.c.bf16 %v403_v12, %v401_v11  ;;  %v457_v29 = vld [vmem:[#allocation2 + $0x6a0] sm:$0xff]  ;;  %v432_v11 = vld [vmem:[#allocation2 + $0x5d8] sm:$0xff]  ;;  %v1204_v12 = vpack.c.bf16 %v427_v9, %v425_v8 }
  0x7e   : > { %546 = vmatmul.mubr.f32.vlgmr.msra.gmra.mrb[0].mxu1 %v238_v38  ;;  %v1182_v26 = vpack.c.bf16 %v408_v19, %v406_v15  ;;  %v1236_v37 = vpack.c.bf16 %v459_v30, %v457_v29  ;;  %v431_v15 = vld [vmem:[#allocation2 + $0x5d0] sm:$0xff]  ;;  %v786_v30 = vld [vmem:[%s1732_s3 + $0x98] sm:$0xff]  ;;  %v795_v60 = vld [vmem:[%s1732_s3 + $0xe0] sm:$0xff] }
  0x7f   : > { %1217 = vmatpush1.bf16.msra.mxu1 %v1216_v39  ;;  %758 = vmatprep.mubr.f32.mxu1 %v1443_v61  ;;  %v414_v39 = vld [vmem:[#allocation2 + $0x548] sm:$0xff]  ;;  %v785_v29 = vld [vmem:[%s1732_s3 + $0x90] sm:$0xff] }
  0x80   : > { %1161 = vmatpush1.bf16.msra.mxu0 %v1160_v23  ;;  %1219 = vmatprep.subr.bf16.mxu1 %v1218_v43  ;;  %v405_v23 = vld [vmem:[#allocation2 + $0x500] sm:$0xff]  ;;  %v416_v43 = vld [vmem:[#allocation2 + $0x558] sm:$0xff]  ;;  %v422_v61 = vld [vmem:[#allocation2 + $0x588] sm:$0xff]  ;;  %v1250_v32 = vpack.c.bf16 %v786_v30, %v785_v29 }
  0x81   : > { %1163 = vmatprep.subr.bf16.mxu0 %v1162_v27  ;;  %v410_v27 = vld [vmem:[#allocation2 + $0x528] sm:$0xff]  ;;  %v1184_v34 = vpack.c.bf16 %v407_v24, %v405_v23  ;;  %v242_v23 = vld [vmem:[%s1568_s9 + $0x20] sm:$0xff]  ;;  %s1378_s9 = scalar_lea.vmem %s1377_s8, 256 }
  0x82   : > { %v1186_v38 = vpack.c.bf16 %v412_v31, %v410_v27  ;;  %v783_v24 = vld [vmem:[%s1732_s3 + $0x80] sm:$0xff]  ;;  %p1380_p3 = scmp.lt.s32.totalorder %s1378_s9, %s1372_s7 }
  0x83   : > { %1221 = vmatpush1.bf16.msra.mxu1 %v1220_v52  ;;  %v465_v52 = vld [vmem:[#allocation2 + $0x6e0] sm:$0xff] }
  0x84   : > { %1165 = vmatpush1.bf16.msra.mxu0 %v1164_v36  ;;  %1223 = vmatprep.subr.bf16.mxu1 %v1222_v55  ;;  %v411_v36 = vld [vmem:[#allocation2 + $0x530] sm:$0xff]  ;;  %v420_v55 = vld [vmem:[#allocation2 + $0x578] sm:$0xff]  ;;  %p1381_p4 = por %p1380_p3, %p1379_p2 }
  0x85   : > { %1167 = vmatprep.subr.bf16.mxu0 %v1166_v41  ;;  %v461_v41 = vld [vmem:[#allocation2 + $0x6c0] sm:$0xff]  ;;  %v1188_v46 = vpack.c.bf16 %v411_v36, %v409_v35  ;;  %v1194_v58 = vpack.c.bf16 %v420_v55, %v418_v54  ;;  %v788_v36 = vld [vmem:[%s1732_s3 + $0xa8] sm:$0xff]  ;;  %v794_v54 = vld [vmem:[%s1732_s3 + $0xd8] sm:$0xff] }
  0x86   : > { %v1240_v48 = vpack.c.bf16 %v463_v42, %v461_v41  ;;  %v787_v35 = vld [vmem:[%s1732_s3 + $0xa0] sm:$0xff]  ;;  %v789_v41 = vld [vmem:[%s1732_s3 + $0xb0] sm:$0xff]  ;;  %v790_v42 = vld [vmem:[%s1732_s3 + $0xb8] sm:$0xff]  ;;  %p1382_p7 = pnand %p1381_p4, %p1375_p12 }
  0x87   : > { %1225 = vmatpush1.bf16.msra.mxu1 %v1224_v1  ;;  %v1258_v44 = vpack.c.bf16 %v790_v42, %v789_v41 }
  0x88   : > { %1169 = vmatpush1.bf16.msra.mxu0 %v1168_v49  ;;  %1227 = vmatprep.subr.bf16.mxu1 %v1226_v4  ;;  %v1190_v49 = vpack.c.bf16 %v416_v43, %v414_v39  ;;  %v426_v4 = vld [vmem:[#allocation2 + $0x5a8] sm:$0xff]  ;;  %v771_v39 = vld [vmem:[%s1732_s3 + $0x20] sm:$0xff] }
  0x89   : > { %1171 = vmatprep.subr.bf16.mxu0 %v1170_v53  ;;  %v467_v53 = vld [vmem:[#allocation2 + $0x6f0] sm:$0xff]  ;;  %v1202_v7 = vpack.c.bf16 %v428_v5, %v426_v4 }
  0x8a   : > { %v1244_v57 = vpack.c.bf16 %v467_v53, %v465_v52  ;;  %v776_v52 = vld [vmem:[%s1732_s3 + $0x48] sm:$0xff]  ;;  %v793_v53 = vld [vmem:[%s1732_s3 + $0xd0] sm:$0xff] }
  0x8b   : > { %1229 = vmatpush1.bf16.msra.mxu1 %v1228_v13  ;;  %v781_v5 = vld [vmem:[%s1732_s3 + $0x70] sm:$0xff] }
  0x8c   : > { %1173 = vmatpush1.bf16.msra.mxu0 %v1172_v62  ;;  %1231 = vmatprep.subr.bf16.mxu1 %v1230_v16  ;;  %v424_v62 = vld [vmem:[#allocation2 + $0x598] sm:$0xff]  ;;  %v434_v16 = vld [vmem:[#allocation2 + $0x5e8] sm:$0xff] }
  0x8d   : > { %1175 = vmatprep.subr.bf16.mxu0 %v1174_v2  ;;  %v1198_v1 = vpack.c.bf16 %v424_v62, %v422_v61  ;;  %v421_v2 = vld [vmem:[#allocation2 + $0x580] sm:$0xff]  ;;  %v1210_v19 = vpack.c.bf16 %v436_v17, %v434_v16  ;;  %v796_v61 = vld [vmem:[%s1732_s3 + $0xe8] sm:$0xff] }
  0x8e   : > { %v1200_v6 = vpack.c.bf16 %v423_v3, %v421_v2  ;;  %v1270_v62 = vpack.c.bf16 %v796_v61, %v795_v60  ;;  %v797_v2 = vld [vmem:[%s1732_s3 + $0xf0] sm:$0xff]  ;;  %v798_v3 = vld [vmem:[%s1732_s3 + $0xf8] sm:$0xff] }
  0x8f   : > { %1233 = vmatpush1.bf16.msra.mxu1 %v1232_v25  ;;  %v784_v25 = vld [vmem:[%s1732_s3 + $0x88] sm:$0xff]  ;;  %v1274_v4 = vpack.c.bf16 %v798_v3, %v797_v2 }
  0x90   : > { %1177 = vmatpush1.bf16.msra.mxu0 %v1176_v10  ;;  %1235 = vmatprep.subr.bf16.mxu1 %v1234_v28  ;;  %v430_v10 = vld [vmem:[#allocation2 + $0x5c8] sm:$0xff]  ;;  %v1246_v27 = vpack.c.bf16 %v784_v25, %v783_v24 }
  0x91   : > { %1179 = vmatprep.subr.bf16.mxu0 %v1178_v14  ;;  %v1206_v13 = vpack.c.bf16 %v432_v11, %v430_v10  ;;  %v429_v14 = vld [vmem:[#allocation2 + $0x5c0] sm:$0xff]  ;;  %v768_v28 = vld [vmem:[%s1732_s3 + $0x8] sm:$0xff] }
  0x92   : > { %v1208_v18 = vpack.c.bf16 %v431_v15, %v429_v14  ;;  %v469_v15 = vld [vmem:[%s1731_s2] sm:$0x3] }
  0x93   : > { %1237 = vmatpush1.bf16.msra.mxu1 %v1236_v37 }
  0x94   : > { %1181 = vmatpush1.bf16.msra.mxu0 %v1180_v22  ;;  %1239 = vmatprep.subr.bf16.mxu1 %v1238_v40  ;;  %v1212_v22 = vpack.c.bf16 %v435_v21, %v433_v20  ;;  %v772_v40 = vld [vmem:[%s1732_s3 + $0x28] sm:$0xff] }
  0x95   : > { %1183 = vmatprep.subr.bf16.mxu0 %v1182_v26  ;;  %v767_v26 = vld [vmem:[%s1732_s3] sm:$0xff]  ;;  %v1256_v43 = vpack.c.bf16 %v772_v40, %v771_v39 }
  0x96   : > { %v1248_v31 = vpack.c.bf16 %v768_v28, %v767_v26 }
  0x97   : > { %1241 = vmatpush1.bf16.msra.mxu1 %v1240_v48  ;;  %v792_v48 = vld [vmem:[%s1732_s3 + $0xc8] sm:$0xff] }
  0x98   : > { %1185 = vmatpush1.bf16.msra.mxu0 %v1184_v34  ;;  %1243 = vmatprep.subr.bf16.mxu1 %v1242_v51  ;;  %v770_v34 = vld [vmem:[%s1732_s3 + $0x18] sm:$0xff]  ;;  %v1262_v50 = vpack.c.bf16 %v792_v48, %v791_v47  ;;  %v775_v51 = vld [vmem:[%s1732_s3 + $0x40] sm:$0xff] }
  0x99   : > { %1187 = vmatprep.subr.bf16.mxu0 %v1186_v38  ;;  %v1252_v37 = vpack.c.bf16 %v770_v34, %v769_v33  ;;  %v1254_v38 = vpack.c.bf16 %v788_v36, %v787_v35  ;;  %v1264_v55 = vpack.c.bf16 %v776_v52, %v775_v51 }
  0x9b   : > { %1245 = vmatpush1.bf16.msra.mxu1 %v1244_v57  ;;  %v777_v57 = vld [vmem:[%s1732_s3 + $0x50] sm:$0xff] }
  0x9c   : > { %1189 = vmatpush1.bf16.msra.mxu0 %v1188_v46  ;;  %1247 = vmatprep.subr.bf16.mxu1 %v1246_v27  ;;  %v774_v46 = vld [vmem:[%s1732_s3 + $0x38] sm:$0xff] }
  0x9d   : > { %1191 = vmatprep.subr.bf16.mxu0 %v1190_v49  ;;  %v1260_v49 = vpack.c.bf16 %v774_v46, %v773_v45 }
  0x9e   : > { %759 = vmatmul.mubr.f32.vlgmr.msra.gmra.mrb[2].mxu1 %v244_v0  ;;  %v780_v0 = vld [vmem:[%s1732_s3 + $0x68] sm:$0xff] }
  0x9f   : > { %1249 = vmatpush3.bf16.msra.mxu1 %v1248_v31  ;;  %v982_v31 = vld [vmem:[%s1733_s4] ss:$0 sm:$0xff] }
  0xa0   : > { %1193 = vmatpush1.bf16.msra.mxu0 %v1192_v56  ;;  %1251 = vmatprep.subr.bf16.mxu1 %v1250_v32  ;;  %v1266_v56 = vpack.c.bf16 %v794_v54, %v793_v53 }
  0xa1   : > { %1195 = vmatprep.subr.bf16.mxu0 %v1194_v58  ;;  %v778_v58 = vld [vmem:[%s1732_s3 + $0x58] sm:$0xff] }
  0xa2   : > { %v1268_v59 = vpack.c.bf16 %v778_v58, %v777_v57 }
  0xa3   : > { %1253 = vmatpush3.bf16.msra.mxu1 %v1252_v37 }
  0xa4   : > { %1197 = vmatpush1.bf16.msra.mxu0 %v1196_v63  ;;  %1255 = vmatprep.subr.bf16.mxu1 %v1254_v38  ;;  %v779_v63 = vld [vmem:[%s1732_s3 + $0x60] sm:$0xff] }
  0xa5   : > { %1199 = vmatprep.subr.bf16.mxu0 %v1198_v1  ;;  %v1272_v1 = vpack.c.bf16 %v780_v0, %v779_v63 }
  0xa7   : > { %1257 = vmatpush3.bf16.msra.mxu1 %v1256_v43 }
  0xa8   : > { %1201 = vmatpush1.bf16.msra.mxu0 %v1200_v6  ;;  %1259 = vmatprep.subr.bf16.mxu1 %v1258_v44  ;;  %v782_v6 = vld [vmem:[%s1732_s3 + $0x78] sm:$0xff] }
  0xa9   : > { %1203 = vmatprep.subr.bf16.mxu0 %v1202_v7  ;;  %v1276_v7 = vpack.c.bf16 %v782_v6, %v781_v5 }
  0xab   : > { %1261 = vmatpush3.bf16.msra.mxu1 %v1260_v49 }
  0xac   : > { %1205 = vmatpush1.bf16.msra.mxu0 %v1204_v12  ;;  %1263 = vmatprep.subr.bf16.mxu1 %v1262_v50  ;;  %v471_v12 = vlaneseq }
  0xad   : > { %1207 = vmatprep.subr.bf16.mxu0 %v1206_v13 }
  0xae   : > { %v472_v13 = vshrl.u32 %v471_v12, 7 }
  0xaf   : > { %1265 = vmatpush3.bf16.msra.mxu1 %v1264_v55 }
  0xb0   : > { %1209 = vmatpush1.bf16.msra.mxu0 %v1208_v18  ;;  %1267 = vmatprep.subr.bf16.mxu1 %v1266_v56  ;;  %v473_v14 = vsub.s32 0, %v472_v13  ;;  %v477_v16 = vsub.s32 1, %v472_v13 }
  0xb1   : > { %1211 = vmatprep.subr.bf16.mxu0 %v1210_v19 }
  0xb2   : > { %v474_v17 = vrot.slane %v469_v15, %v473_v14  ;;  %v478_v18 = vrot.slane %v469_v15, %v477_v16 }
  0xb3   : > { %1269 = vmatpush3.bf16.msra.mxu1 %v1268_v59 }
  0xb4   : > { %1213 = vmatpush1.bf16.msra.mxu0 %v1212_v22  ;;  %1271 = vmatprep.subr.bf16.mxu1 %v1270_v62 }
  0xb7   : > { %688 = vmatmul.mubr.f32.vlgmr.msra.gmra.mrb[0].mxu0 %v242_v23  ;;  %1273 = vmatpush3.bf16.msra.mxu1 %v1272_v1 }
  0xb8   : > { %1275 = vmatprep.subr.bf16.mxu1 %v1274_v4 }
  0xbb   : > { %1277 = vmatpush3.bf16.msra.mxu1 %v1276_v7 }
 0x151   : > { %v547_v8 = vpop.f32.mrb[0].mxu1 }
 0x152   : > { %v549_v9 = vpop.f32.mrb[1].mxu1  ;;  %v548_v19 = vadd.f32 %v547_v8, %v474_v17 }
 0x153   : > { %v550_v20 = vadd.f32 %v549_v9, %v478_v18 }
 0x171   : > { %v760_v10 = vpop.f32.mrb[2].mxu1 }
 0x172   : > { %v762_v11 = vpop.f32.mrb[3].mxu1 }
 0x18a   : > { %v689_v21 = vpop.f32.mrb[0].mxu0 }
 0x18b   : > { %v1279_v22 = vadd.f32 %v689_v21, %v548_v19  ;;  %v691_v23 = vpop.f32.mrb[1].mxu0 }
 0x18c   : > { %v1282_v24 = vadd.f32 %v691_v23, %v550_v20 }
 0x18d   : > { %v1280_v25 = vadd.f32 %v1279_v22, %v760_v10 }
 0x18e   : > { %v1283_v26 = vadd.f32 %v1282_v24, %v762_v11 }
 0x18f   : > { %v765_v28 = vmax.f32 %v1280_v25, 0.0 }
 0x190   : > { %v766_v27 = vmax.f32 %v1283_v26, 0.0 }
 0x192   : > { %870 = vmatprep.mubr.f32.mxu1 %v766_v27 }
 0x193   : > { %871 = vmatmul.mubr.f32.vlgmr.msra.gmra.mrb[4].mxu1 %v765_v28 }
 0x266   : > { %v1019_v29 = vpop.f32.mrb[4].mxu1 }
 0x267   : > { %v1020_v30 = vpop.f32.mrb[5].mxu1 }
 0x268   : > { %v1021_v32 = vadd.f32 %v1020_v30, %v1019_v29 }
 0x26a   : > { %v873_v33 = vadd.f32 %v1021_v32, %v982_v31 }
 0x26c   : > { %v877_v34 = vsel %vm876_vm0, %v873_v33, -inf }
 0x26d   : > { %878 = vmax.xlane.f32.xlu0 %v877_v34 }
 0x2fa   : > { %v879_v35 = vpop.xlane.xlu0 %878 }
 0x2fb   : > { %v880_v36 = vsub.f32 %v873_v33, %v879_v35 }
 0x2fd   : > { %v881_v37 = vmul.f32 1.442695, %v880_v36 }
 0x2ff   : > { %1340 = vpow2.f32 %v881_v37 }
 0x309   : > { %v1341_v38 = vpop.eup %1340 }
 0x30a   : > { %v883_v39 = vsel %vm876_vm0, %v1341_v38, 0.0 }
 0x30b   : > { %884 = vadd.xlane.f32.xlu0 %v883_v39 }
 0x398   : > { %v885_v40 = vpop.xlane.xlu0 %884 }
 0x399   : > { %1342 = vrcp.f32 %v885_v40 }
 0x3a3   : > { %v1343_v41 = vpop.eup %1342 }
 0x3a4   : > { %v887_v42 = vmul.f32 %v1343_v41, %v1341_v38 }
 0x3a6   : > { %888 = vst.msk [vmem:[%s232_s17] sm:$0xff] %vm876_vm0, %v887_v42 }
 0x3a7   : > { %1385 = shalt.err (!%p1382_p7)
}
 0x3a8   : > { %s1386_s10 = scalar_lea.hbm %s1686_s30, 128  ;;  %s1390_s13 = scalar_lea.hbm %s1734_s5, 256 }
 0x3a9   : > { %p1387_p8 = scmp.ne.s32.totalorder %s1686_s30, %s1386_s10  ;;  %p1391_p1 = scmp.lt.u32.totalorder %s1686_s30, %s1734_s5 }
 0x3aa   : > { %p1392_p0 = scmp.lt.u32.totalorder %s1390_s13, %s1386_s10  ;;  %p1394_p6 = scmp.lt.u32.totalorder %s1386_s10, %s1686_s30 }
 0x3ab   : > { %p1388_p11 = pnand %p1387_p8, %p1745_p9 }
 0x3ac   : > { %p1393_p5 = por %p1392_p0, %p1391_p1 }
 0x3ad   : > { %p1389_p13 = pneg %p1388_p11 }
 0x3ae   : > { %p1395_p10 = por %p1394_p6, %p1393_p5 }
 0x3b0   : > { %p1396_p12 = pnand %p1395_p10, %p1389_p13 }
 0x3b2   : > { %1399 = shalt.err (!%p1396_p12)
}
 0x3b3   : > { %1291 = dma.vmem_to_hbm [thread:$0]  (%p1745_p9), %s1688_s23, 128, %s1686_s30, %s890_s6  }
 0x3b4 PF: > { %p1303_p2 = scmp.ge.s32.totalorder %s1438_s21, 2  ;;  %s915_s16 = sand.u32 1, %s1426_s18  }
 0x3b5   : > { %p1746_p3 = scmp.ne.s32.totalorder %s1739_s29, 0  ;;  %s916_s17 = scalar_lea.sflag [#allocation4], %s915_s16 }
 0x3b7   : > { %p1298_p4 = pnand %p1303_p2, %p1746_p3 }
 0x3b9   : > { %1421 = dma.done.wait (!%p1298_p4), %s916_s17, 128  }
 0x3ba   : > { %1423 = vsyncadd (!%p1298_p4), %s916_s17, 4294967168  ;;  %p16_p7 = scmp.ge.s32.totalorder %s1500_s24, 4   ;;  %s1747_s18 = smov %s1430_s19 }
 0x3bb   : > { %s1748_s19 = smov %s1434_s20  ;;  %s1749_s20 = smov %s1511_s27 }
 0x3bc   : > { %s1750_s21 = smov %s1500_s24  ;;  %18 = sbr.rel (!%p16_p7) target bundleno = 4 (0x4), region = 80 }
 0x3c3   :  { %921 = vsyncpa [#allocation3], 1 }
 0x3c4   :  { %923 = vsyncpa [#allocation3 + $0x1], 1 }
 0x3c5   :  { %924 = vsyncpa [#allocation4], 1 }
 0x3c6   :  { %926 = vsyncpa [#allocation4 + $0x1], 1 }

</bundles_post_ra>
